<compile_context>
chip_gen: v7x
topology: tpu7x:2x2x1
jax: 0.10.0
libtpu: 0.0.40
codegen_flags: <defaults>
</compile_context>

<pallas_src>
import jax
import jax.numpy as jnp
from jax.experimental import pallas as pl
from jax.experimental.pallas import tpu as pltpu


_TB_MAX = 4096          # max batch-tile rows
_SINGLE_TILE_MAX = 1024  # below this, one tile (step overhead dominates anyway)

# Contract the last dim of both operands: (O, H) x (TB, H) -> (O, TB).
_NT_DIMS = (((1,), (1,)), ((), ()))


def _ffn_kernel_out1(x_ref, w1_ref, b1_ref, w2_ref, b2_ref, o_ref):
    """output_dim == 1: lane-dense (1, tb) output via an NT fc2 matmul."""
    # fc1 on the MXU: cast x to bf16 at the MXU boundary, accumulate in f32.
    x = x_ref[...].astype(jnp.bfloat16)
    h = jnp.dot(x, w1_ref[...], preferred_element_type=jnp.float32)
    # Bias + ReLU in f32 on the VPU.
    h = jnp.maximum(h + b1_ref[...], 0.0)
    # TODO(synk): dropout is identity here (p=0 / inference); training-mode
    # stochastic dropout is not implemented.
    # fc2 as an NT matmul so the result lands lane-major: (8, H) x (tb, H)^T
    # -> (8, tb); only row 0 of the LHS is real (rows 1..7 are zero padding).
    logits_t = jax.lax.dot_general(
        w2_ref[...], h, dimension_numbers=_NT_DIMS,
        preferred_element_type=jnp.float32)
    logits = logits_t[0:1, :] + b2_ref[0]          # (1, tb), b2 from SMEM
    o_ref[...] = jax.nn.sigmoid(logits).astype(o_ref.dtype)


def _ffn_kernel_general(x_ref, w1_ref, b1_ref, w2_ref, b2_ref, o_ref):
    """General output_dim variant: fc2 on the MXU, (tb, out_dim) output."""
    x = x_ref[...].astype(jnp.bfloat16)
    h = jnp.dot(x, w1_ref[...], preferred_element_type=jnp.float32)
    h = jnp.maximum(h + b1_ref[...], 0.0)
    # TODO(synk): dropout is identity here (p=0 / inference).
    logits = jnp.dot(h.astype(w2_ref.dtype), w2_ref[...],
                     preferred_element_type=jnp.float32) + b2_ref[...]
    o_ref[...] = jax.nn.sigmoid(logits).astype(o_ref.dtype)


def _round_up(a, b):
    return (a + b - 1) // b * b


def feed_forward_net(x, w1, b1, w2, b2):
    """
    x : (batch, input_features)            (float32 or bfloat16)
    w1: (input_features, hidden_dim)       (transposed vs torch Linear.weight)
    b1: (hidden_dim,)
    w2: (hidden_dim, output_dim)
    b2: (output_dim,)
    returns: (batch, output_dim) float32 sigmoid activations
    """
    orig_batch, in_f = x.shape
    hidden = w1.shape[1]
    out_dim = w2.shape[1]

    # One-time weight prep (a few KiB -- negligible HBM traffic). x itself is
    # passed straight through: no wrapper-side cast, no pad.
    w1_bf16 = w1.astype(jnp.bfloat16)
    b1_2d = b1.astype(jnp.float32).reshape(1, hidden)

    # Batch tiling:
    #   * small batches: a single full-batch tile.
    #   * large batches: up to _TB_MAX rows per tile, but always >= 2 tiles
    #     so both v7x TensorCores get work; tb is a multiple of 128 so the
    #     lane-dense out block stays aligned. Ragged last tile handled by
    #     Pallas (grid = cdiv).
    if orig_batch <= _SINGLE_TILE_MAX:
        tb = orig_batch
    else:
        tb = min(_TB_MAX, _round_up(pl.cdiv(orig_batch, 2), 128))
    num_tiles = pl.cdiv(orig_batch, tb)
    grid = (num_tiles,)

    x_spec = pl.BlockSpec((tb, in_f), lambda i: (i, 0))
    w1_spec = pl.BlockSpec((in_f, hidden), lambda i: (0, 0))
    b1_spec = pl.BlockSpec((1, hidden), lambda i: (0, 0))

    compiler_params = pltpu.CompilerParams(
        dimension_semantics=("parallel",),
        vmem_limit_bytes=48 * 1024 * 1024,
    )

    if out_dim == 1:
        # fc2 weights as an (8, hidden) f32 matrix: row 0 is w2^T, rows 1..7
        # are zeros (full-sublane LHS for the NT matmul). b2 is an SMEM scalar.
        w2_arg = jnp.pad(w2.astype(jnp.float32).reshape(1, hidden),
                         ((0, 7), (0, 0)))
        b2_arg = b2.astype(jnp.float32).reshape(1)
        w2_spec = pl.BlockSpec((8, hidden), lambda i: (0, 0))
        b2_spec = pl.BlockSpec(memory_space=pltpu.MemorySpace.SMEM)
        out_spec = pl.BlockSpec((1, tb), lambda i: (i, 0))

        out = pl.pallas_call(
            _ffn_kernel_out1,
            out_shape=jax.ShapeDtypeStruct((num_tiles, tb), jnp.float32),
            grid=grid,
            in_specs=[x_spec, w1_spec, b1_spec, w2_spec, b2_spec],
            out_specs=out_spec,
            compiler_params=compiler_params,
        )(x, w1_bf16, b1_2d, w2_arg, b2_arg)
        # Lane-dense (num_tiles, tb) -> (batch, 1); tail of the last tile
        # (garbage rows of the ragged x block) is sliced off here.
        out = out.reshape(num_tiles * tb, 1)[:orig_batch]
    else:
        w2_arg = w2.astype(jnp.bfloat16)
        b2_arg = b2.astype(jnp.float32).reshape(1, out_dim)
        w2_spec = pl.BlockSpec((hidden, out_dim), lambda i: (0, 0))
        b2_spec = pl.BlockSpec((1, out_dim), lambda i: (0, 0))
        out_spec = pl.BlockSpec((tb, out_dim), lambda i: (i, 0))

        out = pl.pallas_call(
            _ffn_kernel_general,
            out_shape=jax.ShapeDtypeStruct((orig_batch, out_dim), jnp.float32),
            grid=grid,
            in_specs=[x_spec, w1_spec, b1_spec, w2_spec, b2_spec],
            out_specs=out_spec,
            compiler_params=compiler_params,
        )(x, w1_bf16, b1_2d, w2_arg, b2_arg)
    return out


def _reference(x, w1, b1, w2, b2):
    h = jnp.maximum(
        jnp.dot(x, w1, precision=jax.lax.Precision.HIGHEST) + b1, 0.0)
    return jax.nn.sigmoid(
        jnp.dot(h, w2, precision=jax.lax.Precision.HIGHEST) + b2)


def _make_params(key, in_f, hidden, out_dim):
    kw1, kb1, kw2, kb2 = jax.random.split(key, 4)
    lim1 = 1.0 / jnp.sqrt(in_f)
    w1 = jax.random.uniform(kw1, (in_f, hidden),
                            minval=-lim1, maxval=lim1, dtype=jnp.float32)
    b1 = jax.random.uniform(kb1, (hidden,),
                            minval=-lim1, maxval=lim1, dtype=jnp.float32)
    lim2 = 1.0 / jnp.sqrt(hidden)
    w2 = jax.random.uniform(kw2, (hidden, out_dim),
                            minval=-lim2, maxval=lim2, dtype=jnp.float32)
    b2 = jax.random.uniform(kb2, (out_dim,),
                            minval=-lim2, maxval=lim2, dtype=jnp.float32)
    return w1, b1, w2, b2


if __name__ == "__main__":
    key = jax.random.PRNGKey(0)
    kp1, kx1, kp2, kx2, kp3, kx3 = jax.random.split(key, 6)

    input_features, hidden_dim = 16, 32
    tol = dict(atol=1e-2, rtol=1e-2)  # bf16 fc1 MXU inputs vs f32 reference

    # 1) Small shapes from the module spec: batch=8, out_dim=1 (single tile,
    #    lane-dense output path).
    w1, b1, w2, b2 = _make_params(kp1, input_features, hidden_dim, 1)
    x = jax.random.normal(kx1, (8, input_features), dtype=jnp.float32)
    out = jax.block_until_ready(feed_forward_net(x, w1, b1, w2, b2))
    assert out.shape == (8, 1)
    assert jnp.allclose(out, _reference(x, w1, b1, w2, b2), **tol)

    # 2) Larger batch: >= 2 tiles, ragged last block (no wrapper pad/cast).
    w1, b1, w2, b2 = _make_params(kp2, input_features, hidden_dim, 1)
    x = jax.random.normal(kx2, (2500, input_features), dtype=jnp.float32)
    out = jax.block_until_ready(feed_forward_net(x, w1, b1, w2, b2))
    assert out.shape == (2500, 1)
    assert jnp.allclose(out, _reference(x, w1, b1, w2, b2), **tol)

    # 3) output_dim > 1: exercises the general MXU fc2 path.
    w1, b1, w2, b2 = _make_params(kp3, input_features, hidden_dim, 4)
    x = jax.random.normal(kx3, (8, input_features), dtype=jnp.float32)
    out = jax.block_until_ready(feed_forward_net(x, w1, b1, w2, b2))
    assert out.shape == (8, 4)
    assert jnp.allclose(out, _reference(x, w1, b1, w2, b2), **tol)

    print("KERNEL_OK")
</pallas_src>

<mosaic_0001>
module attributes {stable_mosaic.version = 11 : i64} {
  func.func @_ffn_kernel_out1(%arg0: i32, %arg1: memref<8x16xf32, #tpu.memory_space<vmem>>, %arg2: memref<16x32xbf16, #tpu.memory_space<vmem>>, %arg3: memref<1x32xf32, #tpu.memory_space<vmem>>, %arg4: memref<8x32xf32, #tpu.memory_space<vmem>>, %arg5: memref<1xf32, #tpu.memory_space<smem>>, %arg6: memref<1x8xf32, #tpu.memory_space<vmem>>) attributes {dimension_semantics = [#tpu.dimension_semantics<parallel>], iteration_bounds = array<i64: 1>, scalar_prefetch = 0 : i64, scratch_operands = 0 : i64, tpu.core_type = #tpu.core_type<tc>, window_params = [{transform_indices = @transform_0, window_bounds = array<i64: 8, 16>}, {pipeline_mode = #tpu.pipeline_mode<synchronous>, transform_indices = @transform_1, window_bounds = array<i64: 16, 32>}, {pipeline_mode = #tpu.pipeline_mode<synchronous>, transform_indices = @transform_2, window_bounds = array<i64: 1, 32>}, {pipeline_mode = #tpu.pipeline_mode<synchronous>, transform_indices = @transform_3, window_bounds = array<i64: 8, 32>}, {transform_indices = @transform_4, window_bounds = array<i64: 1>}, {transform_indices = @transform_5, window_bounds = array<i64: 1, 8>}]} {
    %c0 = arith.constant 0 : index
    %c0_0 = arith.constant 0 : index
    %0 = vector.load %arg1[%c0, %c0_0] : memref<8x16xf32, #tpu.memory_space<vmem>>, vector<8x16xf32>
    %1 = arith.truncf %0 : vector<8x16xf32> to vector<8x16xbf16>
    %c0_1 = arith.constant 0 : index
    %c0_2 = arith.constant 0 : index
    %2 = vector.load %arg2[%c0_1, %c0_2] : memref<16x32xbf16, #tpu.memory_space<vmem>>, vector<16x32xbf16>
    %cst = arith.constant dense<0.000000e+00> : vector<8x32xf32>
    %3 = tpu.matmul %1, %2, %cst {dimension_numbers = #tpu.dot_dimension_numbers<[1], [0], [0], [1], [0, 0, 1, 1], [], []>} : vector<8x16xbf16>, vector<16x32xbf16>, vector<8x32xf32> -> vector<8x32xf32>
    %c0_3 = arith.constant 0 : index
    %c0_4 = arith.constant 0 : index
    %4 = vector.load %arg3[%c0_3, %c0_4] : memref<1x32xf32, #tpu.memory_space<vmem>>, vector<1x32xf32>
    %5 = vector.broadcast %4 : vector<1x32xf32> to vector<8x32xf32>
    %6 = arith.addf %3, %5 : vector<8x32xf32>
    %cst_5 = arith.constant 0.000000e+00 : f32
    %7 = vector.broadcast %cst_5 : f32 to vector<8x32xf32>
    %8 = arith.maximumf %6, %7 : vector<8x32xf32>
    %c0_6 = arith.constant 0 : index
    %c0_7 = arith.constant 0 : index
    %9 = vector.load %arg4[%c0_6, %c0_7] : memref<8x32xf32, #tpu.memory_space<vmem>>, vector<8x32xf32>
    %cst_8 = arith.constant dense<0.000000e+00> : vector<8x8xf32>
    %10 = tpu.matmul %9, %8, %cst_8 {dimension_numbers = #tpu.dot_dimension_numbers<[1], [1], [0], [0], [0, 0, 1, 0], [], []>} : vector<8x32xf32>, vector<8x32xf32>, vector<8x8xf32> -> vector<8x8xf32>
    %11 = vector.extract_strided_slice %10 {offsets = [0, 0], sizes = [1, 8], strides = [1, 1]} : vector<8x8xf32> to vector<1x8xf32>
    %c0_9 = arith.constant 0 : index
    %12 = memref.load %arg5[%c0_9] : memref<1xf32, #tpu.memory_space<smem>>
    %13 = vector.broadcast %12 : f32 to vector<1x8xf32>
    %14 = arith.addf %11, %13 : vector<1x8xf32>
    %15 = arith.negf %14 : vector<1x8xf32>
    %16 = math.exp %15 : vector<1x8xf32>
    %cst_10 = arith.constant 1.000000e+00 : f32
    %17 = vector.broadcast %cst_10 : f32 to vector<1x8xf32>
    %18 = arith.addf %17, %16 : vector<1x8xf32>
    %19 = arith.divf %17, %18 : vector<1x8xf32>
    %c0_11 = arith.constant 0 : index
    %c0_12 = arith.constant 0 : index
    %20 = vector.load %arg6[%c0_11, %c0_12] : memref<1x8xf32, #tpu.memory_space<vmem>>, vector<1x8xf32>
    tpu.vector_store %arg6[%c0_11, %c0_12], %19 {strides = array<i32>} : memref<1x8xf32, #tpu.memory_space<vmem>>, vector<1x8xf32>,
    return
  }
  func.func @transform_0(%arg0: i32) -> (i32, i32) {
    %c0_i32 = arith.constant 0 : i32
    %c0_i32_0 = arith.constant 0 : i32
    return %arg0, %c0_i32 : i32, i32
  }
  func.func @transform_1(%arg0: i32) -> (i32, i32) {
    %c0_i32 = arith.constant 0 : i32
    %c0_i32_0 = arith.constant 0 : i32
    %c0_i32_1 = arith.constant 0 : i32
    return %c0_i32, %c0_i32_0 : i32, i32
  }
  func.func @transform_2(%arg0: i32) -> (i32, i32) {
    %c0_i32 = arith.constant 0 : i32
    %c0_i32_0 = arith.constant 0 : i32
    %c0_i32_1 = arith.constant 0 : i32
    return %c0_i32, %c0_i32_0 : i32, i32
  }
  func.func @transform_3(%arg0: i32) -> (i32, i32) {
    %c0_i32 = arith.constant 0 : i32
    %c0_i32_0 = arith.constant 0 : i32
    %c0_i32_1 = arith.constant 0 : i32
    return %c0_i32, %c0_i32_0 : i32, i32
  }
  func.func @transform_4(%arg0: i32) -> i32 {
    %c0_i32 = arith.constant 0 : i32
    %c0_i32_0 = arith.constant 0 : i32
    return %c0_i32 : i32
  }
  func.func @transform_5(%arg0: i32) -> (i32, i32) {
    %c0_i32 = arith.constant 0 : i32
    %c0_i32_0 = arith.constant 0 : i32
    return %arg0, %c0_i32 : i32, i32
  }
}

</mosaic_0001>

<bundles_post_ra>
// kernel: tpu_custom_call.1
= control target key start
LH: loop header
LB: loop body
LE: loop exit
PB: predicated region body
PF: predicated region fallthrough
CT: control target
= control target key end

     0   :  { %11 = vsyncpa [#allocation4], 0  ;;  %s410_s0 = inlined_call_operand.hbm [shape: f32[8,16], index: 0, kind: input, shape index: {}]   ;;  %s411_s1 = inlined_call_operand.hbm [shape: bf16[16,32], index: 1, kind: input, shape index: {}]   ;;  %s412_s2 = inlined_call_operand.vmem [shape: f32[1,32], index: 2, kind: input, shape index: {}]   ;;  %s413_s3 = inlined_call_operand.vmem [shape: f32[8,32], index: 3, kind: input, shape index: {}]   ;;  %s414_s4 = inlined_call_operand.<no memory space> [shape: f32[1], index: 4, kind: input, shape index: {}]   ;;  %s415_s5 = inlined_call_operand.hbm [shape: f32[1,8], index: 5, kind: output, shape index: {}]  }
   0x1   :  { %12 = vsyncpa [#allocation7], 0 }
   0x2   :  { %13 = vsyncpa [#allocation5], 0  ;;  %s321_s18 = smov [#allocation3]   ;;  %s322_s20 = smov [#allocation6]  }
   0x3   :  { %s20_s19 = sshll.u32 %s321_s18, 4  ;;  %s29_s21 = sshll.u32 %s322_s20, 4  ;;  %s21_s19 = int_to_ptr.vmem [resolvable:$true] %s20_s19  ;;  %s358_s21 = int_to_ptr.vmem [resolvable:$true] %s29_s21 }
   0x4   :  { %s249_s24 = scalar_lea.hbm %s410_s0, 128 }
   0x5   :  { %p250_p0 = scmp.ne.s32.totalorder %s410_s0, %s249_s24  ;;  %p253_p1 = scmp.lt.u32.totalorder %s249_s24, %s410_s0 }
   0x7   :  { %p255_p2 = pnand %p253_p1, %p250_p0 }
   0x9   :  { %258 = shalt.err (!%p255_p2)
}
   0xa   :  { %s259_s29 = scalar_lea.vmem %s21_s19, 128  ;;  %p264_p4 = scmp.lt.s32.totalorder %s21_s19, %s21_s19 }
   0xb   :  { %p260_p3 = scmp.ne.s32.totalorder %s21_s19, %s259_s29  ;;  %p265_p5 = scmp.lt.s32.totalorder %s259_s29, %s259_s29 }
   0xd   :  { %p266_p6 = por %p265_p5, %p264_p4 }
   0xf   :  { %p267_p7 = pnand %p266_p6, %p260_p3 }
  0x11   :  { %270 = shalt.err (!%p267_p7)
}
  0x12   :  { %23 = dma.hbm_to_vmem [thread:$0]  %s410_s0, 128, %s21_s19, [#allocation4]  }
  0x13   :  { %s271_s9 = scalar_lea.hbm %s411_s1, 128 }
  0x14   :  { %p272_p8 = scmp.ne.s32.totalorder %s411_s1, %s271_s9  ;;  %p275_p9 = scmp.lt.u32.totalorder %s271_s9, %s411_s1 }
  0x16   :  { %p277_p10 = pnand %p275_p9, %p272_p8 }
  0x18   :  { %280 = shalt.err (!%p277_p10)
}
  0x19   :  { %s281_s14 = scalar_lea.vmem %s358_s21, 128  ;;  %p286_p12 = scmp.lt.s32.totalorder %s358_s21, %s358_s21 }
  0x1a   :  { %p282_p11 = scmp.ne.s32.totalorder %s358_s21, %s281_s14  ;;  %p287_p13 = scmp.lt.s32.totalorder %s281_s14, %s281_s14 }
  0x1c   :  { %p288_p0 = por %p287_p13, %p286_p12 }
  0x1e   :  { %p289_p1 = pnand %p288_p0, %p282_p11 }
  0x20   :  { %292 = shalt.err (!%p289_p1)
}
  0x21   :  { %s323_s0 = smov 64   ;;  %s324_s15 = smov 4  }
  0x22   :  { %35 = dma.hbm_to_vmem [thread:$0]  %s411_s1, 128, %s358_s21, [#allocation7], %s323_s0, %s323_s0, %s324_s15  }
  0x23   :  { %315 = dma.done.wait [#allocation4], 128  }
  0x24   :  { %316 = vsyncadd [#allocation4], 4294967168 }
  0x25   :  { %317 = dma.done.wait [#allocation7], 128  }
  0x26   :  { %318 = vsyncadd [#allocation7], 4294967168  ;;  %v325_v0 = vmov 0.0   ;;  %vm326_vm0 = vmmov 0   ;;  %v244_v1 = vld [vmem:[#allocation6] sm:$0xff]   ;;  %v49_v2 = vld [vmem:[#allocation3] sm:$0xff]  ;;  %v190_v12 = vstv %s414_s4 }
  0x27   :  { %226 = vmatprep.subr.bf16.mxu0 %v325_v0  ;;  %228 = vmatprep.mubr.msk.bf16.mxu0 %vm326_vm0, %v325_v0  ;;  %v50_v3 = vpack.c.bf16 %v49_v2, %v49_v2  ;;  %vm66_vm1 = vcmask 130048   ;;  %v216_v4 = vld [vmem:[%s412_s2] ss:$0 sm:$0xff]  ;;  %vm112_vm2 = vcmask 261120   ;;  %s327_s2 = smov [#allocation8]   ;;  %vm198_vm3 = vcmask 57344  }
  0x28   :  { %232 = vmatprep.subr.mxu1 %v325_v0  ;;  %234 = vmatprep.mubr.msk.f32.mxu1 %vm326_vm0, %v325_v0  ;;  %v111_v11 = vld [vmem:[%s413_s3] sm:$0xff]  ;;  %s206_s23 = sshll.u32 %s327_s2, 4  ;;  %s207_s23 = int_to_ptr.vmem [resolvable:$true] %s206_s23 }
  0x29   :  { %227 = vmatpush3.bf16.msra.mxu0 %v244_v1  ;;  %s293_s3 = scalar_lea.vmem %s207_s23, 16  ;;  %s297_s24 = scalar_lea.vmem %s207_s23, 32 }
  0x2a   :  { %p294_p2 = scmp.ne.s32.totalorder %s207_s23, %s293_s3  ;;  %p298_p3 = scmp.lt.s32.totalorder %s207_s23, %s207_s23 }
  0x2b   :  { %p299_p4 = scmp.lt.s32.totalorder %s297_s24, %s293_s3 }
  0x2c   :  { %229 = vmatmul.mubr.msk.bf16.vlgmr.msra.gmra.mrb[0].mxu0 %vm66_vm1, %v50_v3 }
  0x2d   :  { %p300_p5 = por %p299_p4, %p298_p3 }
  0x2f   :  { %p301_p6 = pnand %p300_p5, %p294_p2 }
  0xff   :  { %v104_v5 = vpop.f32.mrb[0].mxu0 }
 0x100   :  { %v105_v6 = vadd.f32 %v216_v4, %v104_v5  ;;  %v230_v7 = vpop.f32.mrb[1].mxu0 }
 0x101   :  { %v107_v8 = vpop.f32.mrb[2].mxu0 }
 0x102   :  { %v110_v9 = vmax.f32 %v105_v6, 0.0  ;;  %v231_v10 = vpop.f32.mrb[3].mxu0 }
 0x104   :  { %233 = vmatpush3.xpose.msk.msra.mxu1 %vm112_vm2, %v110_v9 }
 0x107   :  { %235 = vmatmul.mubr.msk.f32.vlgmr.msra.gmra.mrb[0].mxu1 %vm112_vm2, %v111_v11 }
 0x1da   :  { %v185_v13 = vpop.f32.mrb[0].mxu1 }
 0x1db   :  { %v191_v14 = vadd.f32 %v190_v12, %v185_v13  ;;  %v236_v15 = vpop.f32.mrb[1].mxu1 }
 0x1dd   :  { %v221_v16 = vmul.f32 -1.442695, %v191_v14 }
 0x1df   :  { %245 = vpow2.f32 %v221_v16 }
 0x1e9   :  { %v246_v17 = vpop.eup %245 }
 0x1ea   :  { %v195_v18 = vadd.f32 1.0, %v246_v17 }
 0x1ec   :  { %247 = vrcp.f32 %v195_v18 }
 0x1f6   :  { %v248_v19 = vpop.eup %247 }
 0x1f7   :  { %199 = vst.msk [vmem:[#allocation8] sm:$0x1] %vm198_vm3, %v248_v19 }
 0x1f8   :  { %304 = shalt.err (!%p301_p6)
}
 0x1f9   :  { %s305_s26 = scalar_lea.hbm %s415_s5, 16 }
 0x1fa   :  { %p306_p7 = scmp.ne.s32.totalorder %s415_s5, %s305_s26  ;;  %p309_p8 = scmp.lt.u32.totalorder %s305_s26, %s415_s5 }
 0x1fc   :  { %p311_p9 = pnand %p309_p8, %p306_p7 }
 0x1fe   :  { %314 = shalt.err (!%p311_p9)
}
 0x1ff   :  { %209 = dma.vmem_to_hbm [thread:$0]  %s207_s23, 16, %s415_s5, [#allocation5]  }
 0x200   :  { %319 = dma.done.wait [#allocation5], 16  }
 0x201   :  { %320 = vsyncadd [#allocation5], 4294967280 }
 0x202   :  { %213 = vsyncpa [#allocation4], 1 }
 0x203   :  { %214 = vsyncpa [#allocation7], 1 }
 0x204   :  { %215 = vsyncpa [#allocation5], 1 }

</bundles_post_ra>
